<compile_context>
chip_gen: v7x
topology: tpu7x:2x2x1
jax: 0.10.0
libtpu: 0.0.40
codegen_flags: <defaults>
</compile_context>

<pallas_src>
import functools

import jax
import jax.numpy as jnp
from jax.experimental import pallas as pl
from jax.experimental.pallas import tpu as pltpu


def _iou_kernel(in_ref, tg_ref, inter_ref, sums_ref, *, n_total, tn):
    """Per-row accumulation of intersection and sum(x)+sum(t)."""
    k = pl.program_id(1)  # reduction-axis position (innermost grid axis)

    @pl.when(k == 0)
    def _init():
        inter_ref[...] = jnp.zeros_like(inter_ref)
        sums_ref[...] = jnp.zeros_like(sums_ref)

    # Hot path: threshold + cast happen in-kernel (VPU work hidden under DMA),
    # so HBM only ever sees the narrow native dtypes.
    x = (in_ref[...] > 0).astype(jnp.float32)
    t = tg_ref[...].astype(jnp.float32)

    def _accumulate(xv, tv):
        inter_ref[...] += jnp.sum(xv * tv, axis=1, keepdims=True)
        sums_ref[...] += jnp.sum(xv + tv, axis=1, keepdims=True)

    if n_total % tn != 0:
        # Ragged tail: only the LAST reduction step pays for the iota mask;
        # every full tile stays pure load + mul/add.
        last = pl.num_programs(1) - 1

        @pl.when(k < last)
        def _full():
            _accumulate(x, t)

        @pl.when(k == last)
        def _tail():
            rem = n_total - k * tn
            lane = jax.lax.broadcasted_iota(jnp.int32, x.shape, dimension=1)
            valid = lane < rem
            # Padded block contents are unspecified (may be NaN/inf), so use
            # jnp.where rather than multiplying by a 0/1 mask.
            _accumulate(jnp.where(valid, x, 0.0), jnp.where(valid, t, 0.0))
    else:
        _accumulate(x, t)


def _pick_fold(batch, n, target_rows=32):
    """Fold factor F for (B, N) -> (B*F, N//F): fills sublanes for small B."""
    if batch >= target_rows or n < 256:
        return 1
    desired = min(-(-target_rows // batch), n)   # ceil(target_rows / batch)
    for f in range(desired, 1, -1):
        if n % f == 0 and (n // f) >= 128:
            return f
    return 1


def calc_iou(inputs, targets, *, smooth=1e-7, tn=131072):
    """IoU per batch element; inputs/targets: same arbitrary shape, batch first."""
    assert inputs.shape == targets.shape
    B = inputs.shape[0]
    N = 1
    for d in inputs.shape[1:]:
        N *= d

    # Sublane fold for small batches (free row-major reshape, native dtype).
    F = _pick_fold(B, N)
    R, M = B * F, N // F
    x = inputs.reshape(R, M)
    t = targets.reshape(R, M)

    # Batch tile: whole thing when tiny; 16-row slabs only when that still
    # leaves >=2 parallel blocks (v7x megacore); else 8-row slabs.
    if R <= 8:
        tb = R
    elif R >= 32 and R % 16 == 0:
        tb = 16
    else:
        tb = 8
    nb = pl.cdiv(R, tb)

    # Reduction tile: as large as possible (amortize ~0.35us/step overhead),
    # capped so 2 inputs x 2 pipeline buffers stay within ~24 MiB of VMEM.
    itm = x.dtype.itemsize + t.dtype.itemsize
    budget_tn = max(128, ((24 << 20) // (2 * tb * itm)) // 128 * 128)
    tn = max(128, min(tn, ((M + 127) // 128) * 128, budget_tn))
    nk = pl.cdiv(M, tn)

    vmem_limit = int(min(max(2 * tb * tn * itm + (4 << 20), 16 << 20), 64 << 20))

    kernel = functools.partial(_iou_kernel, n_total=M, tn=tn)

    inter_rows, sums_rows = pl.pallas_call(
        kernel,
        out_shape=(
            jax.ShapeDtypeStruct((R, 1), jnp.float32),
            jax.ShapeDtypeStruct((R, 1), jnp.float32),
        ),
        grid_spec=pltpu.PrefetchScalarGridSpec(
            num_scalar_prefetch=0,
            grid=(nb, nk),
            in_specs=[
                pl.BlockSpec((tb, tn), lambda b, k: (b, k)),
                pl.BlockSpec((tb, tn), lambda b, k: (b, k)),
            ],
            out_specs=[
                pl.BlockSpec((tb, 1), lambda b, k: (b, 0)),
                pl.BlockSpec((tb, 1), lambda b, k: (b, 0)),
            ],
        ),
        compiler_params=pltpu.CompilerParams(
            dimension_semantics=("parallel", "arbitrary"),
            vmem_limit_bytes=vmem_limit,
        ),
    )(x, t)

    # Tiny epilogue (B*F floats): combine folded-row partials and divide.
    inter = inter_rows[:, 0].reshape(B, F).sum(axis=1)
    sums = sums_rows[:, 0].reshape(B, F).sum(axis=1)
    union = sums - inter
    return (inter + float(smooth)) / (union + float(smooth))


def calc_iou_ref(inputs, targets, smooth=1e-7):
    B = inputs.shape[0]
    x = (inputs > 0).astype(jnp.float32).reshape(B, -1)
    t = targets.astype(jnp.float32).reshape(B, -1)
    inter = jnp.sum(x * t, axis=1)
    union = jnp.sum(x, axis=1) + jnp.sum(t, axis=1) - inter
    return (inter + smooth) / (union + smooth)


if __name__ == "__main__":
    key = jax.random.PRNGKey(0)
    k1, k2, k3, k4, k5, k6 = jax.random.split(key, 6)

    # Case 1: lane-aligned N (sublane-fold path: (2,1024) -> (16,128)).
    B, C, H, W = 2, 4, 16, 16
    logits = jax.random.normal(k1, (B, C, H, W), dtype=jnp.float32)
    masks = (jax.random.uniform(k2, (B, C, H, W)) > 0.5).astype(jnp.float32)
    iou = jax.block_until_ready(calc_iou(logits, masks))
    ref = calc_iou_ref(logits, masks)
    if not jnp.allclose(iou, ref, rtol=1e-5, atol=1e-6):
        raise AssertionError(f"mismatch (aligned): kernel={iou} ref={ref}")

    # Case 2: ragged N (not a multiple of 128) — exercises the gated in-kernel
    # tail mask (only the last reduction step is masked).
    B2, C2, H2, W2 = 2, 3, 17, 17
    logits2 = jax.random.normal(k3, (B2, C2, H2, W2), dtype=jnp.float32)
    masks2 = (jax.random.uniform(k4, (B2, C2, H2, W2)) > 0.5).astype(jnp.float32)
    iou2 = jax.block_until_ready(calc_iou(logits2, masks2))
    ref2 = calc_iou_ref(logits2, masks2)
    if not jnp.allclose(iou2, ref2, rtol=1e-5, atol=1e-6):
        raise AssertionError(f"mismatch (ragged): kernel={iou2} ref={ref2}")

    # Case 3: row count not a multiple of the batch tile — pins the behavior
    # that padded batch rows never contaminate valid rows.
    B3, C3, H3, W3 = 10, 1, 16, 16
    logits3 = jax.random.normal(k5, (B3, C3, H3, W3), dtype=jnp.float32)
    masks3 = (jax.random.uniform(k6, (B3, C3, H3, W3)) > 0.5).astype(jnp.float32)
    iou3 = jax.block_until_ready(calc_iou(logits3, masks3))
    ref3 = calc_iou_ref(logits3, masks3)
    if not jnp.allclose(iou3, ref3, rtol=1e-5, atol=1e-6):
        raise AssertionError(f"mismatch (ragged batch): kernel={iou3} ref={ref3}")

    print("KERNEL_OK")
</pallas_src>

<mosaic_0001>
module attributes {stable_mosaic.version = 11 : i64} {
  func.func @_iou_kernel(%arg0: i32, %arg1: i32, %arg2: memref<8x128xf32, #tpu.memory_space<vmem>>, %arg3: memref<8x128xf32, #tpu.memory_space<vmem>>, %arg4: memref<8x1xf32, #tpu.memory_space<vmem>>, %arg5: memref<8x1xf32, #tpu.memory_space<vmem>>) attributes {dimension_semantics = [#tpu.dimension_semantics<parallel>, #tpu.dimension_semantics<arbitrary>], iteration_bounds = array<i64: 2, 1>, scalar_prefetch = 0 : i64, scratch_operands = 0 : i64, tpu.core_type = #tpu.core_type<tc>, window_params = [{transform_indices = @transform_0, window_bounds = array<i64: 8, 128>}, {transform_indices = @transform_1, window_bounds = array<i64: 8, 128>}, {transform_indices = @transform_2, window_bounds = array<i64: 8, 1>}, {transform_indices = @transform_3, window_bounds = array<i64: 8, 1>}]} {
    %c0_i32 = arith.constant 0 : i32
    %0 = arith.cmpi eq, %arg1, %c0_i32 : i32
    %1 = arith.extui %0 : i1 to i32
    %c0_i32_0 = arith.constant 0 : i32
    %2 = arith.cmpi ne, %1, %c0_i32_0 : i32
    scf.if %2 {
      %cst_14 = arith.constant 0.000000e+00 : f32
      %21 = vector.broadcast %cst_14 : f32 to vector<8x1xf32>
      %c0_15 = arith.constant 0 : index
      %c0_16 = arith.constant 0 : index
      %22 = vector.load %arg4[%c0_15, %c0_16] : memref<8x1xf32, #tpu.memory_space<vmem>>, vector<8x1xf32>
      tpu.vector_store %arg4[%c0_15, %c0_16], %21 {strides = array<i32>} : memref<8x1xf32, #tpu.memory_space<vmem>>, vector<8x1xf32>,
      %cst_17 = arith.constant 0.000000e+00 : f32
      %23 = vector.broadcast %cst_17 : f32 to vector<8x1xf32>
      %c0_18 = arith.constant 0 : index
      %c0_19 = arith.constant 0 : index
      %24 = vector.load %arg5[%c0_18, %c0_19] : memref<8x1xf32, #tpu.memory_space<vmem>>, vector<8x1xf32>
      tpu.vector_store %arg5[%c0_18, %c0_19], %23 {strides = array<i32>} : memref<8x1xf32, #tpu.memory_space<vmem>>, vector<8x1xf32>,
    } else {
    }
    %c0 = arith.constant 0 : index
    %c0_1 = arith.constant 0 : index
    %3 = vector.load %arg2[%c0, %c0_1] : memref<8x128xf32, #tpu.memory_space<vmem>>, vector<8x128xf32>
    %cst = arith.constant 0.000000e+00 : f32
    %4 = vector.broadcast %cst : f32 to vector<8x128xf32>
    %5 = arith.cmpf ogt, %3, %4 : vector<8x128xf32>
    %6 = arith.extui %5 : vector<8x128xi1> to vector<8x128xi32>
    %7 = arith.sitofp %6 : vector<8x128xi32> to vector<8x128xf32>
    %c0_2 = arith.constant 0 : index
    %c0_3 = arith.constant 0 : index
    %8 = vector.load %arg3[%c0_2, %c0_3] : memref<8x128xf32, #tpu.memory_space<vmem>>, vector<8x128xf32>
    %c0_4 = arith.constant 0 : index
    %c0_5 = arith.constant 0 : index
    %9 = vector.load %arg4[%c0_4, %c0_5] : memref<8x1xf32, #tpu.memory_space<vmem>>, vector<8x1xf32>
    %10 = arith.mulf %7, %8 : vector<8x128xf32>
    %cst_6 = arith.constant dense<0.000000e+00> : vector<8xf32>
    %11 = vector.multi_reduction <add>, %10, %cst_6 [1] : vector<8x128xf32> to vector<8xf32>
    %12 = vector.shape_cast %11 : vector<8xf32> to vector<8x1xf32>
    %13 = arith.addf %9, %12 : vector<8x1xf32>
    %c0_7 = arith.constant 0 : index
    %c0_8 = arith.constant 0 : index
    %14 = vector.load %arg4[%c0_7, %c0_8] : memref<8x1xf32, #tpu.memory_space<vmem>>, vector<8x1xf32>
    tpu.vector_store %arg4[%c0_7, %c0_8], %13 {strides = array<i32>} : memref<8x1xf32, #tpu.memory_space<vmem>>, vector<8x1xf32>,
    %c0_9 = arith.constant 0 : index
    %c0_10 = arith.constant 0 : index
    %15 = vector.load %arg5[%c0_9, %c0_10] : memref<8x1xf32, #tpu.memory_space<vmem>>, vector<8x1xf32>
    %16 = arith.addf %7, %8 : vector<8x128xf32>
    %cst_11 = arith.constant dense<0.000000e+00> : vector<8xf32>
    %17 = vector.multi_reduction <add>, %16, %cst_11 [1] : vector<8x128xf32> to vector<8xf32>
    %18 = vector.shape_cast %17 : vector<8xf32> to vector<8x1xf32>
    %19 = arith.addf %15, %18 : vector<8x1xf32>
    %c0_12 = arith.constant 0 : index
    %c0_13 = arith.constant 0 : index
    %20 = vector.load %arg5[%c0_12, %c0_13] : memref<8x1xf32, #tpu.memory_space<vmem>>, vector<8x1xf32>
    tpu.vector_store %arg5[%c0_12, %c0_13], %19 {strides = array<i32>} : memref<8x1xf32, #tpu.memory_space<vmem>>, vector<8x1xf32>,
    return
  }
  func.func @transform_0(%arg0: i32, %arg1: i32) -> (i32, i32) {
    %c0_i32 = arith.constant 0 : i32
    return %arg0, %arg1 : i32, i32
  }
  func.func @transform_1(%arg0: i32, %arg1: i32) -> (i32, i32) {
    %c0_i32 = arith.constant 0 : i32
    return %arg0, %arg1 : i32, i32
  }
  func.func @transform_2(%arg0: i32, %arg1: i32) -> (i32, i32) {
    %c0_i32 = arith.constant 0 : i32
    %c0_i32_0 = arith.constant 0 : i32
    return %arg0, %c0_i32 : i32, i32
  }
  func.func @transform_3(%arg0: i32, %arg1: i32) -> (i32, i32) {
    %c0_i32 = arith.constant 0 : i32
    %c0_i32_0 = arith.constant 0 : i32
    return %arg0, %c0_i32 : i32, i32
  }
}

</mosaic_0001>

<bundles_post_ra>
// kernel: tpu_custom_call.1
= control target key start
LH: loop header
LB: loop body
LE: loop exit
PB: predicated region body
PF: predicated region fallthrough
CT: control target
= control target key end

     0   :  { %9 = vsyncpa [#allocation3], 0  ;;  %s801_s0 = inlined_call_operand.hbm [shape: f32[16,128], index: 0, kind: input, shape index: {}]   ;;  %s802_s1 = inlined_call_operand.hbm [shape: f32[16,128], index: 1, kind: input, shape index: {}]   ;;  %s803_s2 = inlined_call_operand.vmem [shape: f32[16,1], index: 2, kind: output, shape index: {0}]   ;;  %s804_s3 = inlined_call_operand.vmem [shape: f32[16,1], index: 3, kind: output, shape index: {1}]  }
   0x1   :  { %11 = vsyncpa [#allocation3 + $0x1], 0 }
   0x2   :  { %12 = vsyncpa [#allocation5], 0 }
   0x3   :  { %14 = vsyncpa [#allocation5 + $0x1], 0  ;;  %s622_s12 = smov 0   ;;  %s624_s13 = smov 0  }
   0x4   :  { %s626_s14 = smov 0   ;;  %s628_s15 = smov 0  }
   0x5   :  { %s630_s16 = smov 0   ;;  %s632_s17 = smov 0  }
   0x6 LB: > { %s406_s18 = sadd.s32 4294967295, %s597_s17   ;;  %s32_s19 = sadd.s32 1, %s593_s16  ;;  %s597_s17 = sphi %s632_s17, %s20_s17   ;;  %s593_s16 = sphi %s630_s16, %s818_s16   ;;  %s589_s15 = sphi %s628_s15, %s817_s15   ;;  %s585_s14 = sphi %s626_s14, %s816_s14   ;;  %s581_s13 = sphi %s624_s13, %s815_s13   ;;  %s577_s12 = sphi %s622_s12, %s814_s12  }
   0x7   : > { %p34_p0 = scmp.ge.s32.totalorder %s32_s19, 2  ;;  %s41_s20 = sadd.s32 1, %s585_s14 }
   0x8   : > { %p48_p1 = scmp.ne.s32.totalorder %s585_s14, %s581_s13  ;;  %p49_p2 = scmp.eq.s32.totalorder %s597_s17, 0 }
   0x9   : > { %s820_s19 = smov (%p34_p0, %s32_s19), 0  ;;  %p54_p4 = scmp.ne.s32.totalorder %s581_s13, %s577_s12 }
   0xa   : > { %p658_p3 = por %p49_p2, %p48_p1  ;;  %s36_s22 = ssub.s32 %s593_s16, %s820_s19 }
   0xb   : > { %p55_p5 = scmp.eq.s32.totalorder %s406_s18, 0  ;;  %p39_p6 = scmp.eq.s32.totalorder %s36_s22, 0 }
   0xc   : > { %p433_p8 = scmp.lt.s32.totalorder %s597_s17, 2  ;;  %s674_s25 = sand.u32 1, %s585_s14  }
   0xd   : > { %p665_p7 = por %p55_p5, %p54_p4  ;;  %s411_s26 = sshll.u32 %s593_s16, 7 }
   0xe   : > { %s671_s24 = scalar_select %p39_p6, %s585_s14, %s41_s20  }
   0xf   : > { %s807_s23 = scalar_select %p665_p7, 1, 0 }
  0x10   : > { %s410_s27 = sshll.u32 %s674_s25, 3  ;;  %s683_s30 = scalar_lea.hbm %s801_s0, %s411_s26 }
  0x11   : > { %s162_s4 = scalar_lea.vmem [#allocation2], %s410_s27  ;;  %p689_p9 = pnand %p433_p8, %p658_p3 }
  0x12   : > { %s170_s5 = sshll.u32 %s162_s4, 4  ;;  %s159_s7 = scalar_lea.sflag [#allocation3], %s674_s25  ;;  %s693_s5 = int_to_ptr.vmem [resolvable:$true] %s170_s5 }
  0x13   : > { %s483_s8 = scalar_lea.hbm %s683_s30, 128  ;;  %p485_p13 = pneg %p689_p9 }
  0x14   : > { %p484_p12 = scmp.ne.s32.totalorder %s683_s30, %s483_s8  ;;  %s488_s11 = scalar_lea.hbm %s801_s0, 256 }
  0x15   : > { %p489_p2 = scmp.lt.u32.totalorder %s683_s30, %s801_s0  ;;  %p490_p3 = scmp.lt.u32.totalorder %s488_s11, %s483_s8 }
  0x16   : > { %p486_p0 = pnand %p485_p13, %p484_p12  ;;  %p492_p5 = scmp.lt.u32.totalorder %s483_s8, %s683_s30 }
  0x17   : > { %p491_p4 = por %p490_p3, %p489_p2 }
  0x18   : > { %p487_p1 = pneg %p486_p0 }
  0x19   : > { %p493_p6 = por %p492_p5, %p491_p4 }
  0x1b   : > { %p494_p8 = pnand %p493_p6, %p487_p1 }
  0x1d   : > { %497 = shalt.err (!%p494_p8)
}
  0x1e   : > { %s498_s20 = scalar_lea.vmem %s693_s5, 128  ;;  %s599_s21 = smov [#allocation2]  }
  0x1f   : > { %p499_p12 = scmp.ne.s32.totalorder %s693_s5, %s498_s20  ;;  %s503_s22 = sshll.u32 %s599_s21, 4  ;;  %s504_s22 = int_to_ptr.vmem [resolvable:$false] %s503_s22 }
  0x20   : > { %s505_s28 = scalar_lea.vmem %s504_s22, 256  ;;  %p506_p11 = scmp.lt.s32.totalorder %s693_s5, %s504_s22 }
  0x21   : > { %p501_p0 = pnand %p499_p12, %p485_p13  ;;  %p507_p2 = scmp.lt.s32.totalorder %s505_s28, %s498_s20 }
  0x23   : > { %p502_p10 = pneg %p501_p0  ;;  %p508_p3 = por %p507_p2, %p506_p11 }
  0x25   : > { %p509_p4 = pnand %p508_p3, %p502_p10 }
  0x27   : > { %512 = shalt.err (!%p509_p4)
}
  0x28   : > { %429 = dma.hbm_to_vmem [thread:$0]  (!%p689_p9), %s683_s30, 128, %s693_s5, %s159_s7  }
  0x29   : > { %p809_p1 = scmp.lt.s32.totalorder %s597_s17, 3  ;;  %p810_p5 = scmp.ge.s32.totalorder %s597_s17, 1 }
  0x2a   : > { %s736_s9 = scalar_lea.hbm %s802_s1, %s411_s26  ;;  %s181_s10 = scalar_lea.vmem [#allocation4], %s410_s27 }
  0x2b   : > { %p727_p6 = pnand %p810_p5, %p809_p1  ;;  %s189_s11 = sshll.u32 %s181_s10, 4  ;;  %s190_s11 = int_to_ptr.vmem [resolvable:$true] %s189_s11 }
  0x2c   : > { %s178_s30 = scalar_lea.sflag [#allocation5], %s674_s25  ;;  %s513_s5 = scalar_lea.hbm %s736_s9, 128 }
  0x2d   : > { %s811_s29 = scalar_select %p727_p6, 1, 0 }
  0x2e   : > { %p514_p10 = scmp.ne.s32.totalorder %s736_s9, %s513_s5  ;;  %s518_s26 = scalar_lea.hbm %s802_s1, 256 }
  0x2f   : > { %p519_p12 = scmp.lt.u32.totalorder %s736_s9, %s802_s1  ;;  %p520_p0 = scmp.lt.u32.totalorder %s518_s26, %s513_s5 }
  0x30   : > { %p516_p11 = pnand %p514_p10, %p485_p13  ;;  %p522_p3 = scmp.lt.u32.totalorder %s513_s5, %s736_s9 }
  0x31   : > { %p521_p2 = por %p520_p0, %p519_p12 }
  0x32   : > { %p517_p8 = pneg %p516_p11 }
  0x33   : > { %p523_p4 = por %p522_p3, %p521_p2 }
  0x35   : > { %p524_p1 = pnand %p523_p4, %p517_p8 }
  0x37   : > { %527 = shalt.err (!%p524_p1)
}
  0x38   : > { %s528_s25 = scalar_lea.vmem %s190_s11, 128  ;;  %s600_s27 = smov [#allocation4]  }
  0x39   : > { %p529_p5 = scmp.ne.s32.totalorder %s190_s11, %s528_s25  ;;  %s533_s21 = sshll.u32 %s600_s27, 4  ;;  %s534_s21 = int_to_ptr.vmem [resolvable:$false] %s533_s21 }
  0x3a   : > { %s535_s22 = scalar_lea.vmem %s534_s21, 256  ;;  %p536_p7 = scmp.lt.s32.totalorder %s190_s11, %s534_s21 }
  0x3b   : > { %p531_p10 = pnand %p529_p5, %p485_p13  ;;  %p537_p6 = scmp.lt.s32.totalorder %s535_s22, %s528_s25 }
  0x3d   : > { %p532_p11 = pneg %p531_p10  ;;  %p538_p0 = por %p537_p6, %p536_p7 }
  0x3f   : > { %p539_p12 = pnand %p538_p0, %p532_p11 }
  0x41   : > { %542 = shalt.err (!%p539_p12)
}
  0x42   : > { %432 = dma.hbm_to_vmem [thread:$0]  (!%p689_p9), %s736_s9, 128, %s190_s11, %s178_s30  }
  0x43   : > { %p812_p8 = scmp.ne.s32.totalorder %s811_s29, 0 }
  0x44   : > { %s200_s28 = sand.u32 (!%p812_p8), 1, %s581_s13   ;;  %p813_p13 = scmp.ne.s32.totalorder (!%p812_p8), %s807_s23, 0 }
  0x45   : > { %198 = sbr.rel (%p812_p8) target bundleno = 233 (0xe9), region = 28  ;;  %s415_s4 = sshll.u32 (!%p812_p8), %s200_s28, 3 }
  0x46   : > { %s201_s8 = scalar_lea.sflag (!%p812_p8), [#allocation3], %s200_s28  ;;  %s204_s10 = scalar_lea.vmem (!%p812_p8), [#allocation2], %s415_s4 }
  0x4c   : > { %568 = dma.done.wait (%p813_p13), %s201_s8, 128  }
  0x4d   : > { %570 = vsyncadd (%p813_p13), %s201_s8, 4294967168  ;;  %s210_s5 = scalar_lea.sflag [#allocation5], %s200_s28  ;;  %s213_s7 = scalar_lea.vmem [#allocation4], %s415_s4 }
  0x4e   : > { %572 = dma.done.wait (%p813_p13), %s210_s5, 128  }
  0x4f   : > { %574 = vsyncadd (%p813_p13), %s210_s5, 4294967168  ;;  %p244_p7 = scmp.lt.s32.totalorder %s589_s15, 1  ;;  %vm256_vm0 = vcmask 7168   ;;  %v601_v0 = vmov 0.0   ;;  %v259_v1 = vld [vmem:[%s204_s10] sm:$0xff]  ;;  %v263_v2 = vld [vmem:[%s213_s7] sm:$0xff] }
  0x50   : > { %vm260_vm1 = vcmp.gt.f32.partialorder %v259_v1, 0.0 }
  0x51   : > { %s822_s15 = smov (!%p244_p7, %s589_s15), 1  ;;  %v419_v3 = vsel %vm260_vm1, 1.0, %v601_v0 }
  0x52   : > { %s417_s6 = sshll.u32 %s822_s15, 3  ;;  %v265_v4 = vmul.f32 %v419_v3, %v263_v2  ;;  %v272_v5 = vadd.f32 %v419_v3, %v263_v2 }
  0x53   : > { %s247_s11 = scalar_lea.vmem %s803_s2, %s417_s6  ;;  %s251_s12 = scalar_lea.vmem %s804_s3, %s417_s6 }
  0x54   : > { %257 = vst.msk [vmem:[%s247_s11] sm:$0xff] %vm256_vm0, %v601_v0  ;;  %266 = vadd.xlane.f32.xlu0 %v265_v4  ;;  %258 = vst.msk [vmem:[%s251_s12] sm:$0xff] %vm256_vm0, %v601_v0 }
  0x58   : > { %273 = vadd.xlane.f32.xlu0 %v272_v5 }
  0x5b   : > { %v264_v6 = vld [vmem:[%s247_s11] sm:$0xff] }
  0x5c   : > { %v271_v9 = vld [vmem:[%s251_s12] sm:$0xff] }
  0xe1   : > { %v267_v7 = vpop.xlane.xlu0 %266 }
  0xe2   : > { %v268_v8 = vadd.f32 %v267_v7, %v264_v6 }
  0xe4   : > { %270 = vst.msk [vmem:[%s247_s11] sm:$0xff] %vm256_vm0, %v268_v8 }
  0xe5   : > { %v274_v10 = vpop.xlane.xlu0 %273 }
  0xe6   : > { %v275_v11 = vadd.f32 %v274_v10, %v271_v9 }
  0xe8   : > { %276 = vst.msk [vmem:[%s251_s12] sm:$0xff] %vm256_vm0, %v275_v11 }
  0xe9 PF: > { %s20_s17 = sadd.s32 1, %s597_s17   ;;  %s814_s12 = smov %s581_s13 }
  0xea   : > { %p17_p9 = scmp.ge.s32.totalorder %s20_s17, 4   ;;  %s815_s13 = smov %s585_s14 }
  0xeb   : > { %s816_s14 = smov %s671_s24  ;;  %s817_s15 = smov %s593_s16 }
  0xec   : > { %s818_s16 = smov %s820_s19  ;;  %19 = sbr.rel (!%p17_p9) target bundleno = 6 (0x6), region = 97 }
  0xf3   :  { %310 = vsyncpa [#allocation3], 1 }
  0xf4   :  { %312 = vsyncpa [#allocation3 + $0x1], 1 }
  0xf5   :  { %313 = vsyncpa [#allocation5], 1 }
  0xf6   :  { %315 = vsyncpa [#allocation5 + $0x1], 1 }

</bundles_post_ra>
